<compile_context>
chip_gen: v6e
topology: v6e:2x2x1
jax: 0.10.0
libtpu: 0.0.40
codegen_flags: <defaults>
</compile_context>

<pallas_src>
import functools

import jax
import jax.numpy as jnp
from jax.experimental import pallas as pl
from jax.experimental.pallas import tpu as pltpu

LANES = 128
SUBLANES = 8
BLOCK_ROWS = 8192  # (8192, 128) f32 = 4 MiB per input per pipeline buffer


def _tversky_partial_kernel(x_ref, t_ref, px_ref, pt_ref, pxt_ref, *,
                            total_rows, block_rows, blocks_per_shard,
                            mask_needed):
    """Streaming partial-sum kernel over row-blocks of the flattened inputs.

    Grid = (num_shards, blocks_per_shard); shard axis is "parallel" (maps to
    the two TensorCores on v7x), inner block axis is the sequential reduction.

    x_ref, t_ref : (block_rows, LANES) tiles in native dtype (cast to f32 here)
    p*_ref       : (1, SUBLANES, LANES) f32 resident output accumulators,
                   holding per-shard partial sums of x, t and x*t.
    """
    j = pl.program_id(1)

    @pl.when(j == 0)
    def _():
        px_ref[...] = jnp.zeros_like(px_ref)
        pt_ref[...] = jnp.zeros_like(pt_ref)
        pxt_ref[...] = jnp.zeros_like(pxt_ref)

    x = x_ref[...].astype(jnp.float32)
    t = t_ref[...].astype(jnp.float32)

    groups = block_rows // SUBLANES

    def accumulate(xv, tv):
        # Regroup the tile into (groups, 8, 128) whole vregs and add them into
        # the (8, 128) accumulator: pure VALU adds, no per-step XLU reduce,
        # no masked (1, 128) read-modify-write.
        px_ref[0] += jnp.sum(xv.reshape(groups, SUBLANES, LANES), axis=0)
        pt_ref[0] += jnp.sum(tv.reshape(groups, SUBLANES, LANES), axis=0)
        pxt_ref[0] += jnp.sum((xv * tv).reshape(groups, SUBLANES, LANES), axis=0)

    if mask_needed:
        s = pl.program_id(0)
        row_start = (s * blocks_per_shard + j) * block_rows
        ragged = row_start + block_rows > total_rows

        # Fast path: full in-range block, no masking work at all.
        @pl.when(jnp.logical_not(ragged))
        def _():
            accumulate(x, t)

        # Slow path: only the last (ragged) block and any grid-padding blocks
        # (whose index_map was clamped) pay for the iota + selects.
        @pl.when(ragged)
        def _():
            rid = jax.lax.broadcasted_iota(jnp.int32, x.shape, 0) + row_start
            valid = rid < total_rows
            accumulate(jnp.where(valid, x, 0.0), jnp.where(valid, t, 0.0))
    else:
        accumulate(x, t)


def _prep_input(a):
    a = jnp.asarray(a)
    if a.dtype in (jnp.float32, jnp.bfloat16):
        return a
    return a.astype(jnp.float32)


def _prep_target(a):
    """Keep targets narrow in HBM; the kernel upcasts per-tile on the VPU."""
    a = jnp.asarray(a)
    if a.dtype == jnp.bool_:
        return a.astype(jnp.int8)          # 1 B/elem instead of 4 B/elem
    if a.dtype in (jnp.int8, jnp.int32, jnp.float32, jnp.bfloat16):
        return a
    if jnp.issubdtype(a.dtype, jnp.integer):
        return a.astype(jnp.int32)
    return a.astype(jnp.float32)


def logcosh_tversky_loss(inputs, targets, alpha=0.5, beta=0.5, smooth=1.0):
    """JAX wrapper matching logcoshTverskyLoss.forward (returns scalar f32)."""
    alpha = float(alpha)
    beta = float(beta)
    smooth = float(smooth)

    x = _prep_input(inputs).reshape(-1)
    t = _prep_target(targets).reshape(-1)
    n = x.shape[0]

    # Pad only up to the lane width (zeros are neutral for all three sums);
    # the common NCHW case (H*W multiple of 128) needs no pad at all.
    lane_pad = (-n) % LANES
    if lane_pad:
        x = jnp.pad(x, (0, lane_pad))
        t = jnp.pad(t, (0, lane_pad))
    rows = (n + lane_pad) // LANES

    x2 = x.reshape(rows, LANES)
    t2 = t.reshape(rows, LANES)

    if rows <= BLOCK_ROWS:
        # Single block covering the whole (small) array.  Pad rows to a
        # multiple of 32 so the in-kernel (-1, 8, 128) regroup and the int8
        # (32, 128) minimum tile are always satisfied (a few KiB at most).
        row_pad = (-rows) % 32
        if row_pad:
            x2 = jnp.pad(x2, ((0, row_pad), (0, 0)))
            t2 = jnp.pad(t2, ((0, row_pad), (0, 0)))
            rows += row_pad
        block_rows = rows
    else:
        block_rows = BLOCK_ROWS

    num_blocks = pl.cdiv(rows, block_rows)
    # Two shards on the leading "parallel" axis: uses both TensorCores on
    # v7x, and is a plain sequential split on single-core v5e/v6e.
    num_shards = 2 if num_blocks >= 2 else 1
    blocks_per_shard = pl.cdiv(num_blocks, num_shards)
    # Mask needed iff the (rectangular) grid covers more rows than exist:
    # ragged last block and/or grid-padding blocks on the last shard.
    mask_needed = (num_shards * blocks_per_shard * block_rows) != rows

    def in_index_map(s, j):
        b = s * blocks_per_shard + j
        if mask_needed:
            # Clamp grid-padding blocks onto the last real block; their
            # contribution is zeroed in-kernel by the row mask.
            b = jnp.minimum(b, num_blocks - 1)
        return (b, 0)

    out_index_map = lambda s, j: (s, 0, 0)

    kernel = functools.partial(
        _tversky_partial_kernel,
        total_rows=rows,
        block_rows=block_rows,
        blocks_per_shard=blocks_per_shard,
        mask_needed=mask_needed,
    )

    part_shape = jax.ShapeDtypeStruct((num_shards, SUBLANES, LANES), jnp.float32)

    px, pt, pxt = pl.pallas_call(
        kernel,
        out_shape=(part_shape, part_shape, part_shape),
        grid_spec=pltpu.PrefetchScalarGridSpec(
            num_scalar_prefetch=0,
            grid=(num_shards, blocks_per_shard),
            in_specs=[
                pl.BlockSpec((block_rows, LANES), in_index_map),
                pl.BlockSpec((block_rows, LANES), in_index_map),
            ],
            out_specs=[
                pl.BlockSpec((1, SUBLANES, LANES), out_index_map),
                pl.BlockSpec((1, SUBLANES, LANES), out_index_map),
                pl.BlockSpec((1, SUBLANES, LANES), out_index_map),
            ],
        ),
        compiler_params=pltpu.CompilerParams(
            dimension_semantics=("parallel", "arbitrary"),
            # Clears v5e's 16 MiB / v6e's 32 MiB default scoped limits for the
            # double-buffered 4 MiB tiles; stays under v7x's 64 MiB physical.
            vmem_limit_bytes=48 * 1024 * 1024,
        ),
    )(x2, t2)

    # Tiny finalize on the per-shard partials (3 * num_shards * 8 * 128 f32).
    sx = jnp.sum(px)
    st = jnp.sum(pt)
    sxt = jnp.sum(pxt)
    tp = sxt
    fp = sx - sxt            # sum((1 - t) * x)
    fn = st - sxt            # sum(t * (1 - x))
    tversky = (tp + smooth) / (tp + alpha * fp + beta * fn + smooth)
    z = 1.0 - tversky        # bounded in [0, 1): log(cosh(z)) cannot overflow
    return jnp.log(jnp.cosh(z))


def _reference(inputs, targets, alpha=0.5, beta=0.5, smooth=1.0):
    x = jnp.asarray(inputs, jnp.float32).reshape(-1)
    t = jnp.asarray(targets, jnp.float32).reshape(-1)
    tp = jnp.sum(x * t)
    fp = jnp.sum((1.0 - t) * x)
    fn = jnp.sum(t * (1.0 - x))
    tversky = (tp + smooth) / (tp + alpha * fp + beta * fn + smooth)
    return jnp.log(jnp.cosh(1.0 - tversky))


if __name__ == "__main__":
    key = jax.random.PRNGKey(0)
    k1, k2, k3, k4, k5, k6 = jax.random.split(key, 6)

    # 1) Small NCHW case, float targets (typical module usage).
    inputs = jax.nn.sigmoid(jax.random.normal(k1, (2, 4, 16, 16), jnp.float32))
    targets = (jax.random.uniform(k2, (2, 4, 16, 16)) > 0.5).astype(jnp.float32)
    loss = jax.block_until_ready(
        logcosh_tversky_loss(inputs, targets, alpha=0.5, beta=0.5, smooth=1.0))
    ref = _reference(inputs, targets)
    assert jnp.allclose(loss, ref, atol=1e-5, rtol=1e-5), (loss, ref)

    # 2) Non-multiple-of-128 element count + bool targets (int8 streaming path).
    inputs2 = jax.nn.sigmoid(jax.random.normal(k3, (3, 5, 7, 9), jnp.float32))
    targets2 = jax.random.uniform(k4, (3, 5, 7, 9)) > 0.5
    loss2 = jax.block_until_ready(logcosh_tversky_loss(inputs2, targets2))
    ref2 = _reference(inputs2, targets2.astype(jnp.float32))
    assert jnp.allclose(loss2, ref2, atol=1e-5, rtol=1e-5), (loss2, ref2)

    # 3) Multi-block case: exercises the 2-shard grid, the clamped grid-padding
    #    block and the ragged-last-block mask (20000 rows -> 3 blocks of 8192).
    inputs3 = jax.nn.sigmoid(jax.random.normal(k5, (2, 4, 800, 400), jnp.float32))
    targets3 = jax.random.uniform(k6, (2, 4, 800, 400)) > 0.5
    loss3 = jax.block_until_ready(logcosh_tversky_loss(inputs3, targets3))
    ref3 = _reference(inputs3, targets3.astype(jnp.float32))
    assert jnp.allclose(loss3, ref3, atol=1e-4, rtol=1e-4), (loss3, ref3)

    print("KERNEL_OK")
</pallas_src>

<mosaic_0001>
module attributes {stable_mosaic.version = 11 : i64} {
  func.func @_tversky_partial_kernel(%arg0: i32, %arg1: i32, %arg2: memref<32x128xf32, #tpu.memory_space<vmem>>, %arg3: memref<32x128xf32, #tpu.memory_space<vmem>>, %arg4: memref<1x8x128xf32, #tpu.memory_space<vmem>>, %arg5: memref<1x8x128xf32, #tpu.memory_space<vmem>>, %arg6: memref<1x8x128xf32, #tpu.memory_space<vmem>>) attributes {dimension_semantics = [#tpu.dimension_semantics<parallel>, #tpu.dimension_semantics<arbitrary>], iteration_bounds = array<i64: 1, 1>, scalar_prefetch = 0 : i64, scratch_operands = 0 : i64, tpu.core_type = #tpu.core_type<tc>, window_params = [{transform_indices = @transform_0, window_bounds = array<i64: 32, 128>}, {transform_indices = @transform_1, window_bounds = array<i64: 32, 128>}, {transform_indices = @transform_2, window_bounds = array<i64: 1, 8, 128>}, {transform_indices = @transform_3, window_bounds = array<i64: 1, 8, 128>}, {transform_indices = @transform_4, window_bounds = array<i64: 1, 8, 128>}]} {
    %c0_i32 = arith.constant 0 : i32
    %0 = arith.cmpi eq, %arg1, %c0_i32 : i32
    %1 = arith.extui %0 : i1 to i32
    %c0_i32_0 = arith.constant 0 : i32
    %2 = arith.cmpi ne, %1, %c0_i32_0 : i32
    scf.if %2 {
      %cst_24 = arith.constant 0.000000e+00 : f32
      %30 = vector.broadcast %cst_24 : f32 to vector<1x8x128xf32>
      %c0_25 = arith.constant 0 : index
      %c0_26 = arith.constant 0 : index
      %c0_27 = arith.constant 0 : index
      %31 = vector.load %arg4[%c0_25, %c0_26, %c0_27] : memref<1x8x128xf32, #tpu.memory_space<vmem>>, vector<1x8x128xf32>
      tpu.vector_store %arg4[%c0_25, %c0_26, %c0_27], %30 {strides = array<i32>} : memref<1x8x128xf32, #tpu.memory_space<vmem>>, vector<1x8x128xf32>,
      %cst_28 = arith.constant 0.000000e+00 : f32
      %32 = vector.broadcast %cst_28 : f32 to vector<1x8x128xf32>
      %c0_29 = arith.constant 0 : index
      %c0_30 = arith.constant 0 : index
      %c0_31 = arith.constant 0 : index
      %33 = vector.load %arg5[%c0_29, %c0_30, %c0_31] : memref<1x8x128xf32, #tpu.memory_space<vmem>>, vector<1x8x128xf32>
      tpu.vector_store %arg5[%c0_29, %c0_30, %c0_31], %32 {strides = array<i32>} : memref<1x8x128xf32, #tpu.memory_space<vmem>>, vector<1x8x128xf32>,
      %cst_32 = arith.constant 0.000000e+00 : f32
      %34 = vector.broadcast %cst_32 : f32 to vector<1x8x128xf32>
      %c0_33 = arith.constant 0 : index
      %c0_34 = arith.constant 0 : index
      %c0_35 = arith.constant 0 : index
      %35 = vector.load %arg6[%c0_33, %c0_34, %c0_35] : memref<1x8x128xf32, #tpu.memory_space<vmem>>, vector<1x8x128xf32>
      tpu.vector_store %arg6[%c0_33, %c0_34, %c0_35], %34 {strides = array<i32>} : memref<1x8x128xf32, #tpu.memory_space<vmem>>, vector<1x8x128xf32>,
    } else {
    }
    %c0 = arith.constant 0 : index
    %c0_1 = arith.constant 0 : index
    %3 = vector.load %arg2[%c0, %c0_1] : memref<32x128xf32, #tpu.memory_space<vmem>>, vector<32x128xf32>
    %c0_2 = arith.constant 0 : index
    %c0_3 = arith.constant 0 : index
    %4 = vector.load %arg3[%c0_2, %c0_3] : memref<32x128xf32, #tpu.memory_space<vmem>>, vector<32x128xf32>
    %c0_4 = arith.constant 0 : index
    %c0_5 = arith.constant 0 : index
    %c0_6 = arith.constant 0 : index
    %5 = vector.load %arg4[%c0_4, %c0_5, %c0_6] : memref<1x8x128xf32, #tpu.memory_space<vmem>>, vector<1x8x128xf32>
    %6 = vector.shape_cast %5 : vector<1x8x128xf32> to vector<8x128xf32>
    %7 = vector.shape_cast %3 : vector<32x128xf32> to vector<4x8x128xf32>
    %cst = arith.constant dense<0.000000e+00> : vector<8x128xf32>
    %8 = vector.multi_reduction <add>, %7, %cst [0] : vector<4x8x128xf32> to vector<8x128xf32>
    %9 = arith.addf %6, %8 : vector<8x128xf32>
    %c0_7 = arith.constant 0 : index
    %c0_8 = arith.constant 0 : index
    %c0_9 = arith.constant 0 : index
    %10 = vector.load %arg4[%c0_7, %c0_8, %c0_9] : memref<1x8x128xf32, #tpu.memory_space<vmem>>, vector<1x8x128xf32>
    %11 = vector.shape_cast %10 : vector<1x8x128xf32> to vector<8x128xf32>
    %12 = vector.shape_cast %9 : vector<8x128xf32> to vector<1x8x128xf32>
    tpu.vector_store %arg4[%c0_7, %c0_8, %c0_9], %12 {strides = array<i32>} : memref<1x8x128xf32, #tpu.memory_space<vmem>>, vector<1x8x128xf32>,
    %c0_10 = arith.constant 0 : index
    %c0_11 = arith.constant 0 : index
    %c0_12 = arith.constant 0 : index
    %13 = vector.load %arg5[%c0_10, %c0_11, %c0_12] : memref<1x8x128xf32, #tpu.memory_space<vmem>>, vector<1x8x128xf32>
    %14 = vector.shape_cast %13 : vector<1x8x128xf32> to vector<8x128xf32>
    %15 = vector.shape_cast %4 : vector<32x128xf32> to vector<4x8x128xf32>
    %cst_13 = arith.constant dense<0.000000e+00> : vector<8x128xf32>
    %16 = vector.multi_reduction <add>, %15, %cst_13 [0] : vector<4x8x128xf32> to vector<8x128xf32>
    %17 = arith.addf %14, %16 : vector<8x128xf32>
    %c0_14 = arith.constant 0 : index
    %c0_15 = arith.constant 0 : index
    %c0_16 = arith.constant 0 : index
    %18 = vector.load %arg5[%c0_14, %c0_15, %c0_16] : memref<1x8x128xf32, #tpu.memory_space<vmem>>, vector<1x8x128xf32>
    %19 = vector.shape_cast %18 : vector<1x8x128xf32> to vector<8x128xf32>
    %20 = vector.shape_cast %17 : vector<8x128xf32> to vector<1x8x128xf32>
    tpu.vector_store %arg5[%c0_14, %c0_15, %c0_16], %20 {strides = array<i32>} : memref<1x8x128xf32, #tpu.memory_space<vmem>>, vector<1x8x128xf32>,
    %c0_17 = arith.constant 0 : index
    %c0_18 = arith.constant 0 : index
    %c0_19 = arith.constant 0 : index
    %21 = vector.load %arg6[%c0_17, %c0_18, %c0_19] : memref<1x8x128xf32, #tpu.memory_space<vmem>>, vector<1x8x128xf32>
    %22 = vector.shape_cast %21 : vector<1x8x128xf32> to vector<8x128xf32>
    %23 = arith.mulf %3, %4 : vector<32x128xf32>
    %24 = vector.shape_cast %23 : vector<32x128xf32> to vector<4x8x128xf32>
    %cst_20 = arith.constant dense<0.000000e+00> : vector<8x128xf32>
    %25 = vector.multi_reduction <add>, %24, %cst_20 [0] : vector<4x8x128xf32> to vector<8x128xf32>
    %26 = arith.addf %22, %25 : vector<8x128xf32>
    %c0_21 = arith.constant 0 : index
    %c0_22 = arith.constant 0 : index
    %c0_23 = arith.constant 0 : index
    %27 = vector.load %arg6[%c0_21, %c0_22, %c0_23] : memref<1x8x128xf32, #tpu.memory_space<vmem>>, vector<1x8x128xf32>
    %28 = vector.shape_cast %27 : vector<1x8x128xf32> to vector<8x128xf32>
    %29 = vector.shape_cast %26 : vector<8x128xf32> to vector<1x8x128xf32>
    tpu.vector_store %arg6[%c0_21, %c0_22, %c0_23], %29 {strides = array<i32>} : memref<1x8x128xf32, #tpu.memory_space<vmem>>, vector<1x8x128xf32>,
    return
  }
  func.func @transform_0(%arg0: i32, %arg1: i32) -> (i32, i32) {
    %c1_i32 = arith.constant 1 : i32
    %0 = arith.muli %arg0, %c1_i32 : i32
    %1 = arith.addi %0, %arg1 : i32
    %c0_i32 = arith.constant 0 : i32
    %c0_i32_0 = arith.constant 0 : i32
    return %1, %c0_i32 : i32, i32
  }
  func.func @transform_1(%arg0: i32, %arg1: i32) -> (i32, i32) {
    %c1_i32 = arith.constant 1 : i32
    %0 = arith.muli %arg0, %c1_i32 : i32
    %1 = arith.addi %0, %arg1 : i32
    %c0_i32 = arith.constant 0 : i32
    %c0_i32_0 = arith.constant 0 : i32
    return %1, %c0_i32 : i32, i32
  }
  func.func @transform_2(%arg0: i32, %arg1: i32) -> (i32, i32, i32) {
    %c0_i32 = arith.constant 0 : i32
    %c0_i32_0 = arith.constant 0 : i32
    %c0_i32_1 = arith.constant 0 : i32
    return %arg0, %c0_i32, %c0_i32_0 : i32, i32, i32
  }
  func.func @transform_3(%arg0: i32, %arg1: i32) -> (i32, i32, i32) {
    %c0_i32 = arith.constant 0 : i32
    %c0_i32_0 = arith.constant 0 : i32
    %c0_i32_1 = arith.constant 0 : i32
    return %arg0, %c0_i32, %c0_i32_0 : i32, i32, i32
  }
  func.func @transform_4(%arg0: i32, %arg1: i32) -> (i32, i32, i32) {
    %c0_i32 = arith.constant 0 : i32
    %c0_i32_0 = arith.constant 0 : i32
    %c0_i32_1 = arith.constant 0 : i32
    return %arg0, %c0_i32, %c0_i32_0 : i32, i32, i32
  }
}

</mosaic_0001>

<bundles_post_ra>
// kernel: tpu_custom_call.1
= control target key start
LH: loop header
LB: loop body
LE: loop exit
PB: predicated region body
PF: predicated region fallthrough
CT: control target
= control target key end

     0   :  { %10 = vsyncpa [#allocation3], 0  ;;  %s299_s0 = inlined_call_operand.hbm [shape: f32[32,128], index: 0, kind: input, shape index: {}]   ;;  %s300_s1 = inlined_call_operand.hbm [shape: f32[32,128], index: 1, kind: input, shape index: {}]   ;;  %s301_s2 = inlined_call_operand.hbm [shape: f32[1,8,128], index: 2, kind: output, shape index: {0}]   ;;  %s302_s3 = inlined_call_operand.hbm [shape: f32[1,8,128], index: 3, kind: output, shape index: {1}]   ;;  %s303_s4 = inlined_call_operand.hbm [shape: f32[1,8,128], index: 4, kind: output, shape index: {2}]  }
   0x1   :  { %11 = vsyncpa [#allocation6], 0 }
   0x2   :  { %12 = vsyncpa [#allocation4], 0 }
   0x3   :  { %13 = vsyncpa [#allocation9], 0  ;;  %s252_s15 = smov [#allocation2]  }
   0x4   :  { %s23_s16 = sshll.u32 %s252_s15, 4  ;;  %s24_s16 = int_to_ptr.vmem [resolvable:$true] %s23_s16 }
   0x5   :  { %s152_s17 = scalar_lea.vmem %s24_s16, 512  ;;  %p157_p1 = scmp.lt.s32.totalorder %s24_s16, %s24_s16 }
   0x6   :  { %p153_p0 = scmp.ne.s32.totalorder %s24_s16, %s152_s17  ;;  %p158_p2 = scmp.lt.s32.totalorder %s152_s17, %s152_s17 }
   0x8   :  { %p159_p3 = por %p158_p2, %p157_p1 }
   0xa   :  { %p160_p4 = pnand %p159_p3, %p153_p0 }
   0xc   :  { %163 = shalt.err (!%p160_p4)
}
   0xd   :  { %s253_s18 = smov 128   ;;  %s254_s19 = smov 8  }
   0xe   :  { %29 = dma.hbm_to_vmem [thread:$0]  %s299_s0, 512, %s24_s16, [#allocation3], %s253_s18, %s253_s18, %s254_s19  }
   0xf   :  { %s255_s22 = smov [#allocation5]  }
  0x10   :  { %s39_s23 = sshll.u32 %s255_s22, 4  ;;  %s40_s23 = int_to_ptr.vmem [resolvable:$true] %s39_s23 }
  0x11   :  { %s172_s24 = scalar_lea.vmem %s40_s23, 512  ;;  %p177_p6 = scmp.lt.s32.totalorder %s40_s23, %s40_s23 }
  0x12   :  { %p173_p5 = scmp.ne.s32.totalorder %s40_s23, %s172_s24  ;;  %p178_p7 = scmp.lt.s32.totalorder %s172_s24, %s172_s24 }
  0x14   :  { %p179_p8 = por %p178_p7, %p177_p6 }
  0x16   :  { %p180_p9 = pnand %p179_p8, %p173_p5 }
  0x18   :  { %183 = shalt.err (!%p180_p9)
}
  0x19   :  { %45 = dma.hbm_to_vmem [thread:$0]  %s300_s1, 512, %s40_s23, [#allocation6], %s253_s18, %s253_s18, %s254_s19  }
  0x1a   :  { %244 = dma.done.wait [#allocation3], 512  }
  0x1b   :  { %245 = vsyncadd [#allocation3], 4294966784 }
  0x1c   :  { %246 = dma.done.wait [#allocation6], 512  }
  0x1d   :  { %247 = vsyncadd [#allocation6], 4294966784  ;;  %v67_v0 = vld [vmem:[#allocation5] sm:$0xff]  ;;  %v68_v1 = vld [vmem:[#allocation5 + $0x8] sm:$0xff]  ;;  %s256_s0 = smov [#allocation8]   ;;  %s257_s27 = smov [#allocation7]  }
  0x1e   :  { %v69_v2 = vld [vmem:[#allocation5 + $0x10] sm:$0xff]  ;;  %v70_v3 = vld [vmem:[#allocation5 + $0x18] sm:$0xff]  ;;  %v78_v4 = vadd.f32 %v68_v1, %v67_v0  ;;  %v63_v5 = vld [vmem:[#allocation2] sm:$0xff]  ;;  %s109_s1 = sshll.u32 %s256_s0, 4  ;;  %s99_s28 = sshll.u32 %s257_s27, 4  ;;  %s110_s1 = int_to_ptr.vmem [resolvable:$true] %s109_s1  ;;  %s100_s28 = int_to_ptr.vmem [resolvable:$true] %s99_s28 }
  0x1f   :  { %v64_v6 = vld [vmem:[#allocation2 + $0x8] sm:$0xff]  ;;  %v65_v7 = vld [vmem:[#allocation2 + $0x10] sm:$0xff]  ;;  %v66_v8 = vld [vmem:[#allocation2 + $0x18] sm:$0xff]  ;;  %v84_v10 = vmul.f32 %v67_v0, %v63_v5  ;;  %s258_s29 = smov [#allocation10]   ;;  %s184_s5 = scalar_lea.vmem %s110_s1, 128 }
  0x20   :  { %v72_v9 = vadd.f32 %v64_v6, %v63_v5  ;;  %v85_v11 = vmul.f32 %v68_v1, %v64_v6  ;;  %v79_v12 = vadd.f32 %v78_v4, %v69_v2  ;;  %v86_v13 = vmul.f32 %v69_v2, %v65_v7  ;;  %s119_s30 = sshll.u32 %s258_s29, 4  ;;  %p185_p10 = scmp.ne.s32.totalorder %s110_s1, %s184_s5  ;;  %s120_s30 = int_to_ptr.vmem [resolvable:$true] %s119_s30 }
  0x21   :  { %v87_v15 = vmul.f32 %v70_v3, %v66_v8  ;;  %p189_p11 = scmp.lt.s32.totalorder %s110_s1, %s110_s1  ;;  %p190_p12 = scmp.lt.s32.totalorder %s184_s5, %s184_s5 }
  0x22   :  { %v73_v14 = vadd.f32 %v72_v9, %v65_v7  ;;  %v88_v16 = vadd.f32 %v85_v11, %v84_v10  ;;  %v80_v17 = vadd.f32 %v79_v12, %v70_v3 }
  0x23   :  { %p191_p13 = por %p190_p12, %p189_p11 }
  0x24   :  { %v74_v18 = vadd.f32 %v73_v14, %v66_v8  ;;  %v89_v19 = vadd.f32 %v88_v16, %v86_v13  ;;  %82 = vst [vmem:[#allocation8] sm:$0xff] %v80_v17 }
  0x25   :  { %p192_p0 = pnand %p191_p13, %p185_p10 }
  0x26   :  { %v90_v20 = vadd.f32 %v89_v19, %v87_v15  ;;  %76 = vst [vmem:[#allocation7] sm:$0xff] %v74_v18 }
  0x27   :  { %195 = shalt.err (!%p192_p0)
}
  0x28   :  { %112 = dma.vmem_to_hbm [thread:$0]  %s110_s1, 128, %s302_s3, [#allocation9]  }
  0x29   :  { %s204_s8 = scalar_lea.vmem %s100_s28, 128  ;;  %p209_p2 = scmp.lt.s32.totalorder %s100_s28, %s100_s28 }
  0x2a   :  { %p205_p1 = scmp.ne.s32.totalorder %s100_s28, %s204_s8  ;;  %p210_p3 = scmp.lt.s32.totalorder %s204_s8, %s204_s8 }
  0x2c   :  { %p211_p4 = por %p210_p3, %p209_p2 }
  0x2e   :  { %p212_p5 = pnand %p211_p4, %p205_p1 }
  0x30   :  { %215 = shalt.err (!%p212_p5)
}
  0x31   :  { %102 = dma.vmem_to_hbm [thread:$0]  %s100_s28, 128, %s301_s2, [#allocation4]   ;;  %92 = vst [vmem:[#allocation10] sm:$0xff] %v90_v20 }
  0x32   :  { %s224_s11 = scalar_lea.vmem %s120_s30, 128  ;;  %p229_p7 = scmp.lt.s32.totalorder %s120_s30, %s120_s30 }
  0x33   :  { %p225_p6 = scmp.ne.s32.totalorder %s120_s30, %s224_s11  ;;  %p230_p8 = scmp.lt.s32.totalorder %s224_s11, %s224_s11 }
  0x35   :  { %p231_p9 = por %p230_p8, %p229_p7 }
  0x37   :  { %p232_p10 = pnand %p231_p9, %p225_p6 }
  0x39   :  { %235 = shalt.err (!%p232_p10)
}
  0x3a   :  { %122 = dma.vmem_to_hbm [thread:$0]  %s120_s30, 128, %s303_s4, [#allocation9]  }
  0x3b   :  { %248 = dma.done.wait [#allocation4], 128  }
  0x3c   :  { %249 = vsyncadd [#allocation4], 4294967168 }
  0x3d   :  { %250 = dma.done.wait [#allocation9], 256  }
  0x3e   :  { %251 = vsyncadd [#allocation9], 4294967040 }
  0x3f   :  { %132 = vsyncpa [#allocation3], 1 }
  0x40   :  { %133 = vsyncpa [#allocation6], 1 }
  0x41   :  { %134 = vsyncpa [#allocation4], 1 }
  0x42   :  { %135 = vsyncpa [#allocation9], 1 }

</bundles_post_ra>
